<compile_context>
chip_gen: v6e
topology: v6e:2x2x1
jax: 0.10.0
libtpu: 0.0.40
codegen_flags: <defaults>
</compile_context>

<pallas_src>
import math

import jax
import jax.numpy as jnp
from jax.experimental import pallas as pl
from jax.experimental.pallas import tpu as pltpu

# ----------------------------- model config ---------------------------------
B = 2          # batch
SEQ_LEN = 16   # length of the registered `pe` buffer (module's seq_len)
L = 8          # actual sequence length of x (<= SEQ_LEN); forward slices pe[:L]
D_MODEL = 32   # model dim


# ------------------------- pe buffer construction ----------------------------
def _build_pe(seq_len: int, d_model: int) -> jnp.ndarray:
    """Replicates the torch buffer construction in PositionalEncoding.__init__."""
    position = jnp.arange(seq_len, dtype=jnp.float32)[:, None]            # (S, 1)
    div_term = jnp.exp(jnp.arange(0, d_model, 2, dtype=jnp.float32)
                       * (-math.log(10000.0) / d_model))                  # (D/2,)
    ang = position * div_term                                             # (S, D/2)
    pe = jnp.zeros((seq_len, d_model), jnp.float32)
    pe = pe.at[:, 0::2].set(jnp.sin(ang))
    pe = pe.at[:, 1::2].set(jnp.cos(ang))
    return pe                                                             # (S, D)


def prepare_pe(pe: jnp.ndarray, l: int, dtype) -> jnp.ndarray:
    """Call ONCE at init: slice to seq length, flatten lane-dense, cast to x dtype."""
    d = pe.shape[-1]
    return pe[:l, :].reshape(1, l * d).astype(dtype)                      # (1, L*D)


# ------------------------------- kernel --------------------------------------
def _pos_encoding_kernel(x_ref, pe_ref, out_ref):
    # x_ref: (TB, L*D) lane-dense slab; pe_ref: (1, L*D) resident tile,
    # broadcast-added over the batch rows on the VPU.
    out_ref[...] = (x_ref[...] + pe_ref[...]).astype(out_ref.dtype)
    # TODO(synk): training-mode dropout (pltpu.prng_seed / prng_random_bits)
    # is omitted; this matches eval-mode forward where nn.Dropout is identity.


# ------------------------------- wrapper --------------------------------------
def positional_encoding(x: jnp.ndarray, pe2d: jnp.ndarray) -> jnp.ndarray:
    """x: (B, L, D); pe2d: (1, L*D) prepared once via prepare_pe()."""
    b, l, d = x.shape
    ld = l * d
    assert pe2d.shape == (1, ld) and pe2d.dtype == x.dtype
    x2d = x.reshape(b, ld)     # contiguous reshape: free bitcast, lane-dense last dim

    # Row (batch) block: full dim when small (uses the "block == full array dim"
    # exemption), otherwise a large multiple of 8 so the second-minor block dim
    # satisfies the (8,128) rule, stores stay unmasked, and the ~0.35 us
    # per-grid-step overhead is amortized once B*L*D scales up.
    if b <= 8:
        tb = b
    else:
        tb = min(b, 1024)
        tb -= tb % 8
    nb = pl.cdiv(b, tb)

    out2d = pl.pallas_call(
        _pos_encoding_kernel,
        out_shape=jax.ShapeDtypeStruct((b, ld), x.dtype),
        grid=(nb,),
        in_specs=[
            pl.BlockSpec((tb, ld), lambda i: (i, 0)),
            # Constant index_map along the grid axis -> pe stays resident in
            # VMEM, DMA'd from HBM exactly once.
            pl.BlockSpec((1, ld), lambda i: (0, 0)),
        ],
        out_specs=pl.BlockSpec((tb, ld), lambda i: (i, 0)),
        # Pure elementwise add with matching shape/dtype: donate x's buffer.
        input_output_aliases={0: 0},
        compiler_params=pltpu.CompilerParams(
            dimension_semantics=("parallel",)),   # shards rows across v7x's 2 TCs
    )(x2d, pe2d)
    return out2d.reshape(b, l, d)


# ---------------------------- pure-JAX reference ------------------------------
def reference(x, pe):
    return x + pe[None, :x.shape[1], :].astype(x.dtype)


# --------------------------------- main ---------------------------------------
if __name__ == "__main__":
    key = jax.random.PRNGKey(0)
    x = jax.random.normal(key, (B, L, D_MODEL), jnp.float32)
    pe = _build_pe(SEQ_LEN, D_MODEL)
    pe2d = prepare_pe(pe, L, x.dtype)   # hoisted out of the per-forward path

    out = jax.block_until_ready(positional_encoding(x, pe2d))

    ref = reference(x, pe)
    assert out.shape == (B, L, D_MODEL)
    assert jnp.allclose(out, ref, atol=1e-6, rtol=1e-6), \
        f"max abs err {jnp.max(jnp.abs(out - ref))}"

    print("KERNEL_OK")
</pallas_src>

<mosaic_0001>
module attributes {stable_mosaic.version = 11 : i64} {
  func.func @_pos_encoding_kernel(%arg0: i32, %arg1: memref<2x256xf32, #tpu.memory_space<vmem>>, %arg2: memref<1x256xf32, #tpu.memory_space<vmem>>, %arg3: memref<2x256xf32, #tpu.memory_space<vmem>>) attributes {dimension_semantics = [#tpu.dimension_semantics<parallel>], iteration_bounds = array<i64: 1>, scalar_prefetch = 0 : i64, scratch_operands = 0 : i64, tpu.core_type = #tpu.core_type<tc>, window_params = [{transform_indices = @transform_0, window_bounds = array<i64: 2, 256>}, {pipeline_mode = #tpu.pipeline_mode<synchronous>, transform_indices = @transform_1, window_bounds = array<i64: 1, 256>}, {transform_indices = @transform_2, window_bounds = array<i64: 2, 256>}]} {
    %c0 = arith.constant 0 : index
    %c0_0 = arith.constant 0 : index
    %0 = vector.load %arg1[%c0, %c0_0] : memref<2x256xf32, #tpu.memory_space<vmem>>, vector<2x256xf32>
    %c0_1 = arith.constant 0 : index
    %c0_2 = arith.constant 0 : index
    %1 = vector.load %arg2[%c0_1, %c0_2] : memref<1x256xf32, #tpu.memory_space<vmem>>, vector<1x256xf32>
    %2 = vector.broadcast %1 : vector<1x256xf32> to vector<2x256xf32>
    %3 = arith.addf %0, %2 : vector<2x256xf32>
    %c0_3 = arith.constant 0 : index
    %c0_4 = arith.constant 0 : index
    %4 = vector.load %arg3[%c0_3, %c0_4] : memref<2x256xf32, #tpu.memory_space<vmem>>, vector<2x256xf32>
    tpu.vector_store %arg3[%c0_3, %c0_4], %3 {strides = array<i32>} : memref<2x256xf32, #tpu.memory_space<vmem>>, vector<2x256xf32>,
    return
  }
  func.func @transform_0(%arg0: i32) -> (i32, i32) {
    %c0_i32 = arith.constant 0 : i32
    %c0_i32_0 = arith.constant 0 : i32
    return %arg0, %c0_i32 : i32, i32
  }
  func.func @transform_1(%arg0: i32) -> (i32, i32) {
    %c0_i32 = arith.constant 0 : i32
    %c0_i32_0 = arith.constant 0 : i32
    %c0_i32_1 = arith.constant 0 : i32
    return %c0_i32, %c0_i32_0 : i32, i32
  }
  func.func @transform_2(%arg0: i32) -> (i32, i32) {
    %c0_i32 = arith.constant 0 : i32
    %c0_i32_0 = arith.constant 0 : i32
    return %arg0, %c0_i32 : i32, i32
  }
}

</mosaic_0001>

<bundles_post_ra>
// kernel: tpu_custom_call.1
= control target key start
LH: loop header
LB: loop body
LE: loop exit
PB: predicated region body
PF: predicated region fallthrough
CT: control target
= control target key end

     0   :  { %7 = vsyncpa [#allocation3], 0  ;;  %s135_s0 = inlined_call_operand.hbm [shape: f32[2,256], index: 0, kind: input, shape index: {}, may-alias: {0,2}]   ;;  %s136_s1 = inlined_call_operand.vmem [shape: f32[1,256], index: 1, kind: input, shape index: {}]   ;;  %s137_s2 = inlined_call_operand.hbm [shape: f32[2,256], index: 2, kind: output, shape index: {}, may-alias: {0,2}]  }
   0x1   :  { %8 = vsyncpa [#allocation4], 0  ;;  %s108_s9 = smov [#allocation2]  }
   0x2   :  { %s15_s10 = sshll.u32 %s108_s9, 4  ;;  %s16_s10 = int_to_ptr.vmem [resolvable:$true] %s15_s10 }
   0x3   :  { %s72_s11 = scalar_lea.vmem %s16_s10, 64  ;;  %p77_p1 = scmp.lt.s32.totalorder %s16_s10, %s16_s10 }
   0x4   :  { %p73_p0 = scmp.ne.s32.totalorder %s16_s10, %s72_s11  ;;  %p78_p2 = scmp.lt.s32.totalorder %s72_s11, %s72_s11 }
   0x6   :  { %p79_p3 = por %p78_p2, %p77_p1 }
   0x8   :  { %p80_p4 = pnand %p79_p3, %p73_p0 }
   0xa   :  { %83 = shalt.err (!%p80_p4)
}
   0xb   :  { %18 = dma.hbm_to_vmem [thread:$0]  %s135_s0, 64, %s16_s10, [#allocation3]  }
   0xc   :  { %104 = dma.done.wait [#allocation3], 64  }
   0xd   :  { %105 = vsyncadd [#allocation3], 4294967232  ;;  %v27_v0 = vlaneseq  ;;  %v109_v1 = vmov 1983009808   ;;  %v25_v7 = vld [vmem:[%s136_s1] sm:$0x3] }
   0xe   :  { %v37_v2 = vunpack.c.l.s4 %v109_v1  ;;  %v24_v12 = vld [vmem:[#allocation2] sm:$0xf]  ;;  %s110_s16 = smov [#allocation5]  }
   0xf   :  { %v28_v3 = vshrl.u32 %v27_v0, 7  ;;  %s52_s0 = sshll.u32 %s110_s16, 4  ;;  %s53_s0 = int_to_ptr.vmem [resolvable:$true] %s52_s0 }
  0x10   :  { %v38_v6 = vunpack.c.0.s8 %v37_v2  ;;  %s84_s17 = scalar_lea.vmem %s53_s0, 64  ;;  %p89_p6 = scmp.lt.s32.totalorder %s53_s0, %s53_s0 }
  0x11   :  { %v29_v4 = vsub.s32 0, %v28_v3  ;;  %v33_v5 = vsub.s32 1, %v28_v3  ;;  %p85_p5 = scmp.ne.s32.totalorder %s53_s0, %s84_s17  ;;  %p90_p7 = scmp.lt.s32.totalorder %s84_s17, %s84_s17 }
  0x12   :  { %v41_v10 = vsub.s32 %v38_v6, %v28_v3 }
  0x13   :  { %v30_v8 = vrot.slane %v25_v7, %v29_v4  ;;  %v34_v9 = vrot.slane %v25_v7, %v33_v5  ;;  %p91_p8 = por %p90_p7, %p89_p6 }
  0x15   :  { %v35_v11 = vcombine.low %v30_v8, %v34_v9  ;;  %p92_p9 = pnand %p91_p8, %p85_p5 }
  0x17   :  { %v42_v13 = vrot.slane %v35_v11, %v41_v10 }
  0x19   :  { %v44_v14 = vadd.f32 %v42_v13, %v24_v12 }
  0x1b   :  { %45 = vst [vmem:[#allocation5] sm:$0xf] %v44_v14 }
  0x1c   :  { %95 = shalt.err (!%p92_p9)
}
  0x1d   :  { %55 = dma.vmem_to_hbm [thread:$0]  %s53_s0, 64, %s137_s2, [#allocation4]  }
  0x1e   :  { %106 = dma.done.wait [#allocation4], 64  }
  0x1f   :  { %107 = vsyncadd [#allocation4], 4294967232 }
  0x20   :  { %59 = vsyncpa [#allocation3], 1 }
  0x21   :  { %60 = vsyncpa [#allocation4], 1 }

</bundles_post_ra>
